<compile_context>
chip_gen: v7x
topology: tpu7x:2x2x1
jax: 0.10.0
libtpu: 0.0.40
codegen_flags: <defaults>
</compile_context>

<pallas_src>
import math

import jax
import jax.numpy as jnp
from jax.experimental import pallas as pl
from jax.experimental.pallas import tpu as pltpu


# ---------------------------------------------------------------------------
# Kernels
# ---------------------------------------------------------------------------

def _gate_proj_kernel(x_ref, w_ref, b_ref, gx_ref):
    """gx = x @ W_ih.T + bias  — one big MXU-filling matmul over M = T*B rows.

    Bias is folded in here (once per M-tile) so it never has to be broadcast
    on the recurrent critical path.
    """
    cd = w_ref.dtype
    acc = jnp.dot(x_ref[...].astype(cd), w_ref[...],
                  preferred_element_type=jnp.float32)
    gx_ref[...] = (acc + b_ref[...]).astype(gx_ref.dtype)


def _slstm_recurrent_kernel(gx_ref, h0_ref, c0_ref, w_hh_ref,
                            hs_out_ref, c_out_ref, h_scr, c_scr):
    """T_CHUNK timesteps per grid step.

    Only the (B,H)x(H,4H) recurrent matmul + f32 gating is on the serial
    path; input projection and bias are already folded into gx.  W_hh is
    VMEM-resident (constant index_map); h/c carried in f32 scratch across
    grid steps.
    """
    @pl.when(pl.program_id(0) == 0)
    def _():
        h_scr[...] = h0_ref[...].astype(jnp.float32)
        c_scr[...] = c0_ref[...].astype(jnp.float32)

    cd = w_hh_ref.dtype
    H = h_scr.shape[1]
    t_chunk = gx_ref.shape[0]

    w_hh = w_hh_ref[...]          # hoisted load, stays in vregs/VMEM view
    h = h_scr[...]
    c = c_scr[...]
    for t in range(t_chunk):      # static unroll inside one grid step
        gates = gx_ref[t].astype(jnp.float32) + jnp.dot(
            h.astype(cd), w_hh, preferred_element_type=jnp.float32)
        i = jnp.exp(gates[:, 0 * H:1 * H])
        f = jnp.exp(gates[:, 1 * H:2 * H])
        g = jnp.tanh(gates[:, 2 * H:3 * H])
        o = jax.nn.sigmoid(gates[:, 3 * H:4 * H])
        c = f * c + i * g
        h = o * jnp.tanh(c)
        hs_out_ref[t] = h.astype(hs_out_ref.dtype)

    h_scr[...] = h
    c_scr[...] = c
    c_out_ref[...] = c.astype(c_out_ref.dtype)   # constant block -> final c


def _slstm_step_kernel(x_ref, h_ref, c_ref, w_ih_ref, w_hh_ref, b_ref,
                       h_out_ref, c_out_ref):
    """Single cell step: two accumulating MXU dots (no concat) + f32 gating."""
    cd = w_ih_ref.dtype
    gates = (jnp.dot(x_ref[...].astype(cd), w_ih_ref[...],
                     preferred_element_type=jnp.float32)
             + jnp.dot(h_ref[...].astype(cd), w_hh_ref[...],
                       preferred_element_type=jnp.float32)
             + b_ref[...])
    H = h_ref.shape[1]
    i = jnp.exp(gates[:, 0 * H:1 * H])
    f = jnp.exp(gates[:, 1 * H:2 * H])
    g = jnp.tanh(gates[:, 2 * H:3 * H])
    o = jax.nn.sigmoid(gates[:, 3 * H:4 * H])
    c_new = f * c_ref[...].astype(jnp.float32) + i * g
    h_new = o * jnp.tanh(c_new)
    h_out_ref[...] = h_new.astype(h_out_ref.dtype)
    c_out_ref[...] = c_new.astype(c_out_ref.dtype)


# ---------------------------------------------------------------------------
# Helpers
# ---------------------------------------------------------------------------

def _vmem_limit(*byte_counts):
    """Explicit scoped-VMEM request: 2x the live buffers + 4 MiB, clamped."""
    need = 2 * int(sum(int(b) for b in byte_counts)) + (4 << 20)
    return max(16 << 20, min(64 << 20, need))


def _pick_chunk(t, max_chunk=16):
    """Largest divisor of T that is <= max_chunk (timesteps per grid step)."""
    c = min(t, max_chunk)
    while t % c:
        c -= 1
    return max(c, 1)


def _pick_row_tile(m, cap=512):
    """Largest multiple-of-8 divisor of m that is <= cap (m itself if m<=cap)."""
    if m <= cap:
        return m
    t = cap - (cap % 8)
    while t >= 8 and m % t:
        t -= 8
    return t if (t >= 8 and m % t == 0) else m


# ---------------------------------------------------------------------------
# Wrappers
# ---------------------------------------------------------------------------

def prepare_slstm_params(weight_ih, weight_hh, bias, compute_dtype=jnp.bfloat16):
    """Transpose/cast the cell weights ONCE (outside any step loop).

    weight_ih: (4H, I), weight_hh: (4H, H), bias: (4H,)   (PyTorch convention)
    Returns w_ih_t: (I, 4H), w_hh_t: (H, 4H) in compute_dtype, bias2d: (1,4H) f32.
    """
    four_h, _ = weight_ih.shape
    hidden = weight_hh.shape[1]
    assert weight_hh.shape == (four_h, hidden)
    assert bias.shape == (four_h,)
    w_ih_t = weight_ih.T.astype(compute_dtype)
    w_hh_t = weight_hh.T.astype(compute_dtype)
    bias2d = bias.reshape(1, four_h).astype(jnp.float32)
    return w_ih_t, w_hh_t, bias2d


def slstm_cell_forward(x, h, c, w_ih_t, w_hh_t, bias2d):
    """One sLSTM step. x:(B,I) h,c:(B,H) w_ih_t:(I,4H) w_hh_t:(H,4H) bias2d:(1,4H).

    Prefer slstm_sequence_forward for any T > 1: each call here re-DMAs the
    weights from HBM and pays full launch overhead.
    """
    B, I = x.shape
    H = h.shape[1]
    assert w_ih_t.shape == (I, 4 * H) and w_hh_t.shape == (H, 4 * H)
    assert bias2d.shape == (1, 4 * H)

    full = lambda shape: pl.BlockSpec(shape, lambda: (0,) * len(shape))
    wbytes = (int(w_ih_t.size) * w_ih_t.dtype.itemsize
              + int(w_hh_t.size) * w_hh_t.dtype.itemsize)
    cost = pl.CostEstimate(
        flops=2 * B * (I + H) * 4 * H,
        transcendentals=6 * B * H,
        bytes_accessed=wbytes + 4 * (B * I + 4 * B * H + 4 * H))

    h_new, c_new = pl.pallas_call(
        _slstm_step_kernel,
        out_shape=(jax.ShapeDtypeStruct((B, H), x.dtype),
                   jax.ShapeDtypeStruct((B, H), x.dtype)),
        grid_spec=pltpu.PrefetchScalarGridSpec(
            num_scalar_prefetch=0,
            grid=(),
            in_specs=[full((B, I)), full((B, H)), full((B, H)),
                      full((I, 4 * H)), full((H, 4 * H)), full((1, 4 * H))],
            out_specs=[full((B, H)), full((B, H))]),
        compiler_params=pltpu.CompilerParams(
            vmem_limit_bytes=_vmem_limit(wbytes, 4 * B * (I + 6 * H))),
        cost_estimate=cost,
    )(x, h, c, w_ih_t, w_hh_t, bias2d)
    return h_new, c_new


def _gate_projection(xs2d, w_ih_t, bias2d, gx_dtype):
    """gx = xs2d @ w_ih_t + bias, tiled over M rows (parallel grid axis)."""
    M, I = xs2d.shape
    four_h = w_ih_t.shape[1]
    tm = _pick_row_tile(M)
    wbytes = int(w_ih_t.size) * w_ih_t.dtype.itemsize
    gx_item = jnp.dtype(gx_dtype).itemsize
    cost = pl.CostEstimate(
        flops=2 * M * I * four_h,
        transcendentals=0,
        bytes_accessed=(M * I * xs2d.dtype.itemsize + wbytes
                        + M * four_h * gx_item + 4 * four_h))
    vmem_limit = _vmem_limit(wbytes,
                             2 * tm * I * xs2d.dtype.itemsize,
                             2 * tm * four_h * gx_item)
    return pl.pallas_call(
        _gate_proj_kernel,
        out_shape=jax.ShapeDtypeStruct((M, four_h), gx_dtype),
        grid_spec=pltpu.PrefetchScalarGridSpec(
            num_scalar_prefetch=0,
            grid=(M // tm,),
            in_specs=[
                pl.BlockSpec((tm, I), lambda m: (m, 0)),
                pl.BlockSpec((I, four_h), lambda m: (0, 0)),
                pl.BlockSpec((1, four_h), lambda m: (0, 0)),
            ],
            out_specs=pl.BlockSpec((tm, four_h), lambda m: (m, 0))),
        compiler_params=pltpu.CompilerParams(
            dimension_semantics=("parallel",),
            vmem_limit_bytes=vmem_limit),
        cost_estimate=cost,
    )(xs2d, w_ih_t, bias2d)


def slstm_sequence_forward(xs, h0, c0, w_ih_t, w_hh_t, bias2d, max_chunk=16):
    """Run T cell steps: one projection kernel + one chunked recurrent kernel.

    xs: (T, B, I), h0/c0: (B, H). Returns (hs: (T, B, H), c_final: (B, H)).
    H should be a multiple of 128 and B a multiple of 8 for lane-dense layout.
    """
    T, B, I = xs.shape
    H = h0.shape[1]
    assert w_ih_t.shape == (I, 4 * H) and w_hh_t.shape == (H, 4 * H)
    assert bias2d.shape == (1, 4 * H)
    # TODO(synk): pad 4H gate columns to 128-aligned boundaries in
    # prepare_slstm_params if general (non-multiple-of-128) H must be supported.

    gx_dtype = w_ih_t.dtype   # bf16 on the perf path -> halves streamed bytes
    gx = _gate_projection(xs.reshape(T * B, I), w_ih_t, bias2d, gx_dtype)
    gx = gx.reshape(T, B, 4 * H)

    t_chunk = _pick_chunk(T, max_chunk)
    grid = (T // t_chunk,)

    w_bytes = int(w_hh_t.size) * w_hh_t.dtype.itemsize
    gx_item = jnp.dtype(gx_dtype).itemsize
    cost = pl.CostEstimate(
        flops=2 * T * B * H * 4 * H,
        transcendentals=6 * T * B * H,
        bytes_accessed=(w_bytes + T * B * 4 * H * gx_item
                        + T * B * H * xs.dtype.itemsize + 3 * B * H * 4))
    vmem_limit = _vmem_limit(w_bytes,
                             2 * t_chunk * B * 4 * H * gx_item,
                             2 * t_chunk * B * H * xs.dtype.itemsize,
                             4 * B * H * 4)

    hs, c_fin = pl.pallas_call(
        _slstm_recurrent_kernel,
        out_shape=(jax.ShapeDtypeStruct((T, B, H), xs.dtype),
                   jax.ShapeDtypeStruct((B, H), xs.dtype)),
        grid_spec=pltpu.PrefetchScalarGridSpec(
            num_scalar_prefetch=0,
            grid=grid,
            in_specs=[
                pl.BlockSpec((t_chunk, B, 4 * H), lambda t: (t, 0, 0)),  # gx chunk
                pl.BlockSpec((B, H), lambda t: (0, 0)),                  # h0
                pl.BlockSpec((B, H), lambda t: (0, 0)),                  # c0
                pl.BlockSpec((H, 4 * H), lambda t: (0, 0)),              # W_hh resident
            ],
            out_specs=[
                pl.BlockSpec((t_chunk, B, H), lambda t: (t, 0, 0)),      # h_t chunk
                pl.BlockSpec((B, H), lambda t: (0, 0)),                  # final c
            ],
            scratch_shapes=[
                pltpu.VMEM((B, H), jnp.float32),   # h carry (f32)
                pltpu.VMEM((B, H), jnp.float32),   # c carry (f32)
            ]),
        compiler_params=pltpu.CompilerParams(
            dimension_semantics=("arbitrary",),
            vmem_limit_bytes=vmem_limit),
        cost_estimate=cost,
    )(gx, h0, c0, w_hh_t)
    return hs, c_fin


# ---------------------------------------------------------------------------
# References & init
# ---------------------------------------------------------------------------

def _xavier_uniform(key, shape, dtype=jnp.float32):
    fan_out, fan_in = shape
    bound = math.sqrt(6.0 / (fan_in + fan_out))
    return jax.random.uniform(key, shape, dtype=dtype, minval=-bound, maxval=bound)


def _gate_math(gates, c, H):
    i = jnp.exp(gates[:, 0 * H:1 * H])
    f = jnp.exp(gates[:, 1 * H:2 * H])
    g = jnp.tanh(gates[:, 2 * H:3 * H])
    o = jax.nn.sigmoid(gates[:, 3 * H:4 * H])
    c_new = f * c + i * g
    h_new = o * jnp.tanh(c_new)
    return h_new, c_new


def _reference_step_f32(x, h, c, weight_ih, weight_hh, bias):
    """Pure-JAX mirror of the PyTorch forward (full f32)."""
    gates = x @ weight_ih.T + bias + h @ weight_hh.T
    return _gate_math(gates, c, h.shape[1])


def _reference_step_fused(x, h, c, w_ih_t, w_hh_t, bias2d):
    """Reference matching the step kernel's two-dot formulation."""
    cd = w_ih_t.dtype
    gates = (jnp.dot(x.astype(cd), w_ih_t, preferred_element_type=jnp.float32)
             + jnp.dot(h.astype(cd), w_hh_t, preferred_element_type=jnp.float32)
             + bias2d)
    return _gate_math(gates, c.astype(jnp.float32), h.shape[1])


def _reference_sequence(xs, h0, c0, w_ih_t, w_hh_t, bias2d):
    """Mirror of the two-kernel pipeline (projection in cd, gx stored in cd,
    recurrence carried in f32)."""
    cd = w_ih_t.dtype
    T, B, I = xs.shape
    H = h0.shape[1]
    gx = (jnp.dot(xs.reshape(T * B, I).astype(cd), w_ih_t,
                  preferred_element_type=jnp.float32) + bias2d).astype(cd)
    gx = gx.reshape(T, B, 4 * H)
    h = h0.astype(jnp.float32)
    c = c0.astype(jnp.float32)
    hs = []
    for t in range(T):
        gates = gx[t].astype(jnp.float32) + jnp.dot(
            h.astype(cd), w_hh_t, preferred_element_type=jnp.float32)
        h, c = _gate_math(gates, c, H)
        hs.append(h.astype(xs.dtype))
    return jnp.stack(hs, axis=0), c.astype(xs.dtype)


# ---------------------------------------------------------------------------
# Demo / correctness checks
# ---------------------------------------------------------------------------

if __name__ == "__main__":
    # Lane/sublane-aligned small shapes: B=8 sublanes, I=H=128 lanes, T=16.
    B, I, H, T = 8, 128, 128, 16

    key = jax.random.PRNGKey(0)
    k_wih, k_whh, k_x, k_h, k_c, k_xs = jax.random.split(key, 6)

    # Parameter init matching reset_parameters().
    weight_ih = _xavier_uniform(k_wih, (4 * H, I))
    weight_hh = _xavier_uniform(k_whh, (4 * H, H))
    bias = jnp.zeros((4 * H,), dtype=jnp.float32)

    x = jax.random.normal(k_x, (B, I), dtype=jnp.float32)
    h0 = jax.random.normal(k_h, (B, H), dtype=jnp.float32)
    c0 = jax.random.normal(k_c, (B, H), dtype=jnp.float32)
    xs = jax.random.normal(k_xs, (T, B, I), dtype=jnp.float32)

    # --- Check 1: single step, f32 weights, fidelity to the PyTorch forward.
    w_ih_f32, w_hh_f32, b2d = prepare_slstm_params(
        weight_ih, weight_hh, bias, jnp.float32)
    h1, c1 = slstm_cell_forward(x, h0, c0, w_ih_f32, w_hh_f32, b2d)
    jax.block_until_ready((h1, c1))
    h1_ref, c1_ref = _reference_step_f32(x, h0, c0, weight_ih, weight_hh, bias)
    assert jnp.allclose(h1, h1_ref, atol=5e-4, rtol=5e-4), "f32 step h mismatch"
    assert jnp.allclose(c1, c1_ref, atol=5e-4, rtol=5e-4), "f32 step c mismatch"

    # --- Check 2: single step, bf16 perf path (gating stays f32).
    w_ih_bf, w_hh_bf, b2d_bf = prepare_slstm_params(
        weight_ih, weight_hh, bias, jnp.bfloat16)
    h1b, c1b = slstm_cell_forward(x, h0, c0, w_ih_bf, w_hh_bf, b2d_bf)
    jax.block_until_ready((h1b, c1b))
    h1b_ref, c1b_ref = _reference_step_fused(x, h0, c0, w_ih_bf, w_hh_bf, b2d_bf)
    assert jnp.allclose(h1b, h1b_ref, atol=2e-3, rtol=2e-3), "bf16 step h mismatch"
    assert jnp.allclose(c1b, c1b_ref, atol=2e-3, rtol=2e-3), "bf16 step c mismatch"

    # --- Check 3: sequence, f32 path (projection kernel + chunked recurrence,
    #               2 grid steps of 8 timesteps -> exercises the state carry).
    hs32, cf32 = slstm_sequence_forward(
        xs, h0, c0, w_ih_f32, w_hh_f32, b2d, max_chunk=8)
    jax.block_until_ready((hs32, cf32))
    hs32_ref, cf32_ref = _reference_sequence(xs, h0, c0, w_ih_f32, w_hh_f32, b2d)
    assert jnp.allclose(hs32, hs32_ref, atol=2e-3, rtol=2e-3), "f32 seq h mismatch"
    assert jnp.allclose(cf32, cf32_ref, atol=2e-3, rtol=2e-3), "f32 seq c mismatch"

    # --- Check 4: sequence, bf16 perf path (bf16 weights + bf16 streamed gx).
    hsb, cfb = slstm_sequence_forward(
        xs, h0, c0, w_ih_bf, w_hh_bf, b2d_bf, max_chunk=8)
    jax.block_until_ready((hsb, cfb))
    hsb_ref, cfb_ref = _reference_sequence(xs, h0, c0, w_ih_bf, w_hh_bf, b2d_bf)
    assert jnp.allclose(hsb, hsb_ref, atol=8e-3, rtol=8e-3), "bf16 seq h mismatch"
    assert jnp.allclose(cfb, cfb_ref, atol=8e-3, rtol=8e-3), "bf16 seq c mismatch"

    print("KERNEL_OK")
</pallas_src>

<mosaic_0001>
module attributes {stable_mosaic.version = 11 : i64} {
  func.func @_slstm_step_kernel(%arg0: memref<8x128xf32, #tpu.memory_space<vmem>>, %arg1: memref<8x128xf32, #tpu.memory_space<vmem>>, %arg2: memref<8x128xf32, #tpu.memory_space<vmem>>, %arg3: memref<128x512xf32, #tpu.memory_space<vmem>>, %arg4: memref<128x512xf32, #tpu.memory_space<vmem>>, %arg5: memref<1x512xf32, #tpu.memory_space<vmem>>, %arg6: memref<8x128xf32, #tpu.memory_space<vmem>>, %arg7: memref<8x128xf32, #tpu.memory_space<vmem>>) attributes {dimension_semantics = [], scalar_prefetch = 0 : i64, scratch_operands = 0 : i64, tpu.core_type = #tpu.core_type<tc>} {
    %c0 = arith.constant 0 : index
    %c0_0 = arith.constant 0 : index
    %0 = vector.load %arg0[%c0, %c0_0] : memref<8x128xf32, #tpu.memory_space<vmem>>, vector<8x128xf32>
    %c0_1 = arith.constant 0 : index
    %c0_2 = arith.constant 0 : index
    %1 = vector.load %arg3[%c0_1, %c0_2] : memref<128x512xf32, #tpu.memory_space<vmem>>, vector<128x512xf32>
    %cst = arith.constant dense<0.000000e+00> : vector<8x512xf32>
    %2 = tpu.matmul %0, %1, %cst {dimension_numbers = #tpu.dot_dimension_numbers<[1], [0], [0], [1], [0, 0, 1, 1], [], []>} : vector<8x128xf32>, vector<128x512xf32>, vector<8x512xf32> -> vector<8x512xf32>
    %c0_3 = arith.constant 0 : index
    %c0_4 = arith.constant 0 : index
    %3 = vector.load %arg1[%c0_3, %c0_4] : memref<8x128xf32, #tpu.memory_space<vmem>>, vector<8x128xf32>
    %c0_5 = arith.constant 0 : index
    %c0_6 = arith.constant 0 : index
    %4 = vector.load %arg4[%c0_5, %c0_6] : memref<128x512xf32, #tpu.memory_space<vmem>>, vector<128x512xf32>
    %cst_7 = arith.constant dense<0.000000e+00> : vector<8x512xf32>
    %5 = tpu.matmul %3, %4, %cst_7 {dimension_numbers = #tpu.dot_dimension_numbers<[1], [0], [0], [1], [0, 0, 1, 1], [], []>} : vector<8x128xf32>, vector<128x512xf32>, vector<8x512xf32> -> vector<8x512xf32>
    %6 = arith.addf %2, %5 : vector<8x512xf32>
    %c0_8 = arith.constant 0 : index
    %c0_9 = arith.constant 0 : index
    %7 = vector.load %arg5[%c0_8, %c0_9] : memref<1x512xf32, #tpu.memory_space<vmem>>, vector<1x512xf32>
    %8 = vector.broadcast %7 : vector<1x512xf32> to vector<8x512xf32>
    %9 = arith.addf %6, %8 : vector<8x512xf32>
    %10 = vector.extract_strided_slice %9 {offsets = [0, 0], sizes = [8, 128], strides = [1, 1]} : vector<8x512xf32> to vector<8x128xf32>
    %11 = math.exp %10 : vector<8x128xf32>
    %12 = vector.extract_strided_slice %9 {offsets = [0, 128], sizes = [8, 128], strides = [1, 1]} : vector<8x512xf32> to vector<8x128xf32>
    %13 = math.exp %12 : vector<8x128xf32>
    %14 = vector.extract_strided_slice %9 {offsets = [0, 256], sizes = [8, 128], strides = [1, 1]} : vector<8x512xf32> to vector<8x128xf32>
    %15 = math.tanh %14 : vector<8x128xf32>
    %16 = vector.extract_strided_slice %9 {offsets = [0, 384], sizes = [8, 128], strides = [1, 1]} : vector<8x512xf32> to vector<8x128xf32>
    %17 = arith.negf %16 : vector<8x128xf32>
    %18 = math.exp %17 : vector<8x128xf32>
    %cst_10 = arith.constant 1.000000e+00 : f32
    %19 = vector.broadcast %cst_10 : f32 to vector<8x128xf32>
    %20 = arith.addf %19, %18 : vector<8x128xf32>
    %21 = arith.divf %19, %20 : vector<8x128xf32>
    %c0_11 = arith.constant 0 : index
    %c0_12 = arith.constant 0 : index
    %22 = vector.load %arg2[%c0_11, %c0_12] : memref<8x128xf32, #tpu.memory_space<vmem>>, vector<8x128xf32>
    %23 = arith.mulf %13, %22 : vector<8x128xf32>
    %24 = arith.mulf %11, %15 : vector<8x128xf32>
    %25 = arith.addf %23, %24 : vector<8x128xf32>
    %26 = math.tanh %25 : vector<8x128xf32>
    %27 = arith.mulf %21, %26 : vector<8x128xf32>
    %c0_13 = arith.constant 0 : index
    %c0_14 = arith.constant 0 : index
    %28 = vector.load %arg6[%c0_13, %c0_14] : memref<8x128xf32, #tpu.memory_space<vmem>>, vector<8x128xf32>
    tpu.vector_store %arg6[%c0_13, %c0_14], %27 {strides = array<i32>} : memref<8x128xf32, #tpu.memory_space<vmem>>, vector<8x128xf32>,
    %c0_15 = arith.constant 0 : index
    %c0_16 = arith.constant 0 : index
    %29 = vector.load %arg7[%c0_15, %c0_16] : memref<8x128xf32, #tpu.memory_space<vmem>>, vector<8x128xf32>
    tpu.vector_store %arg7[%c0_15, %c0_16], %25 {strides = array<i32>} : memref<8x128xf32, #tpu.memory_space<vmem>>, vector<8x128xf32>,
    return
  }
}

</mosaic_0001>

<bundles_post_ra>
// kernel: tpu_custom_call.1
= control target key start
LH: loop header
LB: loop body
LE: loop exit
PB: predicated region body
PF: predicated region fallthrough
CT: control target
= control target key end

     0   :  { %13 = vsyncpa [#allocation3], 0  ;;  %s1052_s0 = inlined_call_operand.hbm [shape: f32[8,128], index: 0, kind: input, shape index: {}]   ;;  %s1053_s1 = inlined_call_operand.hbm [shape: f32[8,128], index: 1, kind: input, shape index: {}]   ;;  %s1054_s2 = inlined_call_operand.hbm [shape: f32[8,128], index: 2, kind: input, shape index: {}]   ;;  %s1055_s3 = inlined_call_operand.hbm [shape: f32[128,512], index: 3, kind: input, shape index: {}]   ;;  %s1056_s4 = inlined_call_operand.hbm [shape: f32[128,512], index: 4, kind: input, shape index: {}]   ;;  %s1057_s5 = inlined_call_operand.vmem [shape: f32[1,512], index: 5, kind: input, shape index: {}]   ;;  %s1058_s6 = inlined_call_operand.hbm [shape: f32[8,128], index: 6, kind: output, shape index: {0}]   ;;  %s1059_s7 = inlined_call_operand.hbm [shape: f32[8,128], index: 7, kind: output, shape index: {1}]  }
   0x1   :  { %14 = vsyncpa [#allocation6], 0 }
   0x2   :  { %15 = vsyncpa [#allocation9], 0 }
   0x3   :  { %16 = vsyncpa [#allocation4], 0 }
   0x4   :  { %17 = vsyncpa [#allocation13], 0  ;;  %s898_s24 = smov [#allocation5]   ;;  %s899_s26 = smov [#allocation8]  }
   0x5   :  { %s34_s25 = sshll.u32 %s898_s24, 4  ;;  %s53_s27 = sshll.u32 %s899_s26, 4  ;;  %s35_s25 = int_to_ptr.vmem [resolvable:$true] %s34_s25  ;;  %s948_s27 = int_to_ptr.vmem [resolvable:$true] %s53_s27 }
   0x6   :  { %s734_s30 = scalar_lea.hbm %s1053_s1, 128 }
   0x7   :  { %p735_p0 = scmp.ne.s32.totalorder %s1053_s1, %s734_s30  ;;  %p738_p1 = scmp.lt.u32.totalorder %s734_s30, %s1053_s1 }
   0x9   :  { %p740_p2 = pnand %p738_p1, %p735_p0 }
   0xb   :  { %743 = shalt.err (!%p740_p2)
}
   0xc   :  { %s744_s12 = scalar_lea.vmem %s35_s25, 128  ;;  %p749_p4 = scmp.lt.s32.totalorder %s35_s25, %s35_s25 }
   0xd   :  { %p745_p3 = scmp.ne.s32.totalorder %s35_s25, %s744_s12  ;;  %p750_p5 = scmp.lt.s32.totalorder %s744_s12, %s744_s12 }
   0xf   :  { %p751_p6 = por %p750_p5, %p749_p4 }
  0x11   :  { %p752_p7 = pnand %p751_p6, %p745_p3 }
  0x13   :  { %755 = shalt.err (!%p752_p7)
}
  0x14   :  { %37 = dma.hbm_to_vmem [thread:$0]  %s1053_s1, 128, %s35_s25, [#allocation6]  }
  0x15   :  { %s756_s17 = scalar_lea.hbm %s1055_s3, 8192 }
  0x16   :  { %p757_p8 = scmp.ne.s32.totalorder %s1055_s3, %s756_s17  ;;  %p760_p9 = scmp.lt.u32.totalorder %s756_s17, %s1055_s3 }
  0x18   :  { %p762_p10 = pnand %p760_p9, %p757_p8 }
  0x1a   :  { %765 = shalt.err (!%p762_p10)
}
  0x1b   :  { %s766_s22 = scalar_lea.vmem %s948_s27, 8192  ;;  %p771_p12 = scmp.lt.s32.totalorder %s948_s27, %s948_s27 }
  0x1c   :  { %p767_p11 = scmp.ne.s32.totalorder %s948_s27, %s766_s22  ;;  %p772_p13 = scmp.lt.s32.totalorder %s766_s22, %s766_s22 }
  0x1e   :  { %p773_p0 = por %p772_p13, %p771_p12 }
  0x20   :  { %p774_p1 = pnand %p773_p0, %p767_p11 }
  0x22   :  { %777 = shalt.err (!%p774_p1)
}
  0x23   :  { %s900_s1 = smov 512   ;;  %s901_s23 = smov 32  }
  0x24   :  { %59 = dma.hbm_to_vmem [thread:$0]  %s1055_s3, 8192, %s948_s27, [#allocation9], %s900_s1, %s900_s1, %s901_s23  }
  0x25   :  { %s902_s26 = smov [#allocation2]   ;;  %s903_s29 = smov [#allocation7]  }
  0x26   :  { %s24_s28 = sshll.u32 %s902_s26, 4  ;;  %s44_s30 = sshll.u32 %s903_s29, 4  ;;  %s25_s28 = int_to_ptr.vmem [resolvable:$true] %s24_s28  ;;  %s45_s30 = int_to_ptr.vmem [resolvable:$true] %s44_s30 }
  0x27   :  { %s778_s10 = scalar_lea.hbm %s1052_s0, 128 }
  0x28   :  { %p779_p2 = scmp.ne.s32.totalorder %s1052_s0, %s778_s10  ;;  %p782_p3 = scmp.lt.u32.totalorder %s778_s10, %s1052_s0 }
  0x2a   :  { %p784_p4 = pnand %p782_p3, %p779_p2 }
  0x2c   :  { %787 = shalt.err (!%p784_p4)
}
  0x2d   :  { %s788_s3 = scalar_lea.vmem %s25_s28, 128  ;;  %p793_p6 = scmp.lt.s32.totalorder %s25_s28, %s25_s28 }
  0x2e   :  { %p789_p5 = scmp.ne.s32.totalorder %s25_s28, %s788_s3  ;;  %p794_p7 = scmp.lt.s32.totalorder %s788_s3, %s788_s3 }
  0x30   :  { %p795_p8 = por %p794_p7, %p793_p6 }
  0x32   :  { %p796_p9 = pnand %p795_p8, %p789_p5 }
  0x34   :  { %799 = shalt.err (!%p796_p9)
}
  0x35   :  { %27 = dma.hbm_to_vmem [thread:$0]  %s1052_s0, 128, %s25_s28, [#allocation3]  }
  0x36   :  { %s800_s18 = scalar_lea.hbm %s1054_s2, 128 }
  0x37   :  { %p801_p10 = scmp.ne.s32.totalorder %s1054_s2, %s800_s18  ;;  %p804_p11 = scmp.lt.u32.totalorder %s800_s18, %s1054_s2 }
  0x39   :  { %p806_p12 = pnand %p804_p11, %p801_p10 }
  0x3b   :  { %809 = shalt.err (!%p806_p12)
}
  0x3c   :  { %s810_s24 = scalar_lea.vmem %s45_s30, 128  ;;  %p815_p0 = scmp.lt.s32.totalorder %s45_s30, %s45_s30 }
  0x3d   :  { %p811_p13 = scmp.ne.s32.totalorder %s45_s30, %s810_s24  ;;  %p816_p1 = scmp.lt.s32.totalorder %s810_s24, %s810_s24 }
  0x3f   :  { %p817_p2 = por %p816_p1, %p815_p0 }
  0x41   :  { %p818_p3 = pnand %p817_p2, %p811_p13 }
  0x43   :  { %821 = shalt.err (!%p818_p3)
}
  0x44   :  { %47 = dma.hbm_to_vmem [thread:$0]  %s1054_s2, 128, %s45_s30, [#allocation6]  }
  0x45   :  { %s904_s26 = smov [#allocation10]   ;;  %s822_s9 = scalar_lea.hbm %s1056_s4, 8192 }
  0x46   :  { %s65_s28 = sshll.u32 %s904_s26, 4  ;;  %p823_p4 = scmp.ne.s32.totalorder %s1056_s4, %s822_s9  ;;  %s66_s28 = int_to_ptr.vmem [resolvable:$true] %s65_s28 }
  0x47   :  { %p826_p5 = scmp.lt.u32.totalorder %s822_s9, %s1056_s4 }
  0x49   :  { %p828_p6 = pnand %p826_p5, %p823_p4 }
  0x4b   :  { %831 = shalt.err (!%p828_p6)
}
  0x4c   :  { %s832_s14 = scalar_lea.vmem %s66_s28, 8192  ;;  %p837_p8 = scmp.lt.s32.totalorder %s66_s28, %s66_s28 }
  0x4d   :  { %p833_p7 = scmp.ne.s32.totalorder %s66_s28, %s832_s14  ;;  %p838_p9 = scmp.lt.s32.totalorder %s832_s14, %s832_s14 }
  0x4f   :  { %p839_p10 = por %p838_p9, %p837_p8 }
  0x51   :  { %p840_p11 = pnand %p839_p10, %p833_p7 }
  0x53   :  { %843 = shalt.err (!%p840_p11)
}
  0x54   :  { %71 = dma.hbm_to_vmem [thread:$0]  %s1056_s4, 8192, %s66_s28, [#allocation9], %s900_s1, %s900_s1, %s901_s23  }
  0x55   :  { %888 = dma.done.wait [#allocation3], 128  }
  0x56   :  { %889 = vsyncadd [#allocation3], 4294967168 }
  0x57   :  { %890 = dma.done.wait [#allocation6], 256  }
  0x58   :  { %891 = vsyncadd [#allocation6], 4294967040 }
  0x59   :  { %892 = dma.done.wait [#allocation9], 16384  }
  0x5a   :  { %893 = vsyncadd [#allocation9], 4294950912  ;;  %v905_v0 = vmov 0.0   ;;  %v156_v1 = vld [vmem:[#allocation10 + $0x8] sm:$0xff]  ;;  %v158_v3 = vld [vmem:[#allocation10 + $0x18] sm:$0xff] }
  0x5b   :  { %283 = vmatprep.mubr.f32.mxu0 %v905_v0  ;;  %354 = vmatprep.mubr.f32.mxu1 %v905_v0  ;;  %v160_v2 = vld [vmem:[#allocation10 + $0x28] sm:$0xff]  ;;  %v162_v5 = vld [vmem:[#allocation10 + $0x38] sm:$0xff]  ;;  %v155_v6 = vld [vmem:[#allocation10] sm:$0xff] }
  0x5c   :  { %v580_v4 = vpack.c.bf16 %v160_v2, %v156_v1  ;;  %v159_v7 = vld [vmem:[#allocation10 + $0x20] sm:$0xff]  ;;  %v612_v8 = vpack.c.bf16 %v162_v5, %v158_v3  ;;  %v157_v10 = vld [vmem:[#allocation10 + $0x10] sm:$0xff]  ;;  %v164_v12 = vld [vmem:[#allocation10 + $0x48] sm:$0xff] }
  0x5d   :  { %v582_v9 = vpack.c.bf16 %v159_v7, %v155_v6  ;;  %v161_v11 = vld [vmem:[#allocation10 + $0x30] sm:$0xff]  ;;  %v168_v14 = vld [vmem:[#allocation10 + $0x68] sm:$0xff]  ;;  %v166_v15 = vld [vmem:[#allocation10 + $0x58] sm:$0xff] }
  0x5e   :  { %581 = vmatprep.subr.bf16.mxu0 %v580_v4  ;;  %v614_v13 = vpack.c.bf16 %v161_v11, %v157_v10  ;;  %v170_v16 = vld [vmem:[#allocation10 + $0x78] sm:$0xff]  ;;  %613 = vmatprep.subr.bf16.mxu1 %v612_v8  ;;  %v584_v17 = vpack.c.bf16 %v168_v14, %v164_v12  ;;  %v163_v19 = vld [vmem:[#allocation10 + $0x40] sm:$0xff]  ;;  %v165_v21 = vld [vmem:[#allocation10 + $0x50] sm:$0xff] }
  0x5f   :  { %583 = vmatpush1.bf16.msra.mxu0 %v582_v9  ;;  %v616_v18 = vpack.c.bf16 %v170_v16, %v166_v15  ;;  %v167_v20 = vld [vmem:[#allocation10 + $0x60] sm:$0xff]  ;;  %v169_v23 = vld [vmem:[#allocation10 + $0x70] sm:$0xff]  ;;  %v172_v24 = vld [vmem:[#allocation10 + $0x88] sm:$0xff] }
  0x60   :  { %615 = vmatpush1.bf16.msra.mxu1 %v614_v13  ;;  %v586_v22 = vpack.c.bf16 %v167_v20, %v163_v19  ;;  %v176_v25 = vld [vmem:[#allocation10 + $0xa8] sm:$0xff]  ;;  %585 = vmatprep.subr.bf16.mxu0 %v584_v17  ;;  %v618_v26 = vpack.c.bf16 %v169_v23, %v165_v21  ;;  %v174_v28 = vld [vmem:[#allocation10 + $0x98] sm:$0xff]  ;;  %v171_v30 = vld [vmem:[#allocation10 + $0x80] sm:$0xff] }
  0x61   :  { %617 = vmatprep.subr.bf16.mxu1 %v616_v18  ;;  %v588_v27 = vpack.c.bf16 %v176_v25, %v172_v24  ;;  %v178_v29 = vld [vmem:[#allocation10 + $0xb8] sm:$0xff]  ;;  %v175_v32 = vld [vmem:[#allocation10 + $0xa0] sm:$0xff]  ;;  %v173_v33 = vld [vmem:[#allocation10 + $0x90] sm:$0xff] }
  0x62   :  { %v620_v31 = vpack.c.bf16 %v178_v29, %v174_v28  ;;  %v177_v34 = vld [vmem:[#allocation10 + $0xb0] sm:$0xff]  ;;  %v590_v35 = vpack.c.bf16 %v175_v32, %v171_v30  ;;  %v180_v36 = vld [vmem:[#allocation10 + $0xc8] sm:$0xff]  ;;  %v182_v38 = vld [vmem:[#allocation10 + $0xd8] sm:$0xff] }
  0x63   :  { %587 = vmatpush1.bf16.msra.mxu0 %v586_v22  ;;  %v184_v37 = vld [vmem:[#allocation10 + $0xe8] sm:$0xff]  ;;  %v622_v39 = vpack.c.bf16 %v177_v34, %v173_v33  ;;  %v186_v41 = vld [vmem:[#allocation10 + $0xf8] sm:$0xff]  ;;  %v179_v42 = vld [vmem:[#allocation10 + $0xc0] sm:$0xff] }
  0x64   :  { %619 = vmatpush1.bf16.msra.mxu1 %v618_v26  ;;  %589 = vmatprep.subr.bf16.mxu0 %v588_v27  ;;  %v592_v40 = vpack.c.bf16 %v184_v37, %v180_v36  ;;  %v183_v43 = vld [vmem:[#allocation10 + $0xe0] sm:$0xff]  ;;  %v624_v44 = vpack.c.bf16 %v186_v41, %v182_v38  ;;  %v181_v45 = vld [vmem:[#allocation10 + $0xd0] sm:$0xff]  ;;  %v188_v47 = vld [vmem:[#allocation10 + $0x108] sm:$0xff] }
  0x65   :  { %621 = vmatprep.subr.bf16.mxu1 %v620_v31  ;;  %v185_v46 = vld [vmem:[#allocation10 + $0xf0] sm:$0xff]  ;;  %v192_v48 = vld [vmem:[#allocation10 + $0x128] sm:$0xff]  ;;  %v190_v49 = vld [vmem:[#allocation10 + $0x118] sm:$0xff]  ;;  %v594_v51 = vpack.c.bf16 %v183_v43, %v179_v42 }
  0x66   :  { %v194_v50 = vld [vmem:[#allocation10 + $0x138] sm:$0xff]  ;;  %v626_v52 = vpack.c.bf16 %v185_v46, %v181_v45  ;;  %v596_v53 = vpack.c.bf16 %v192_v48, %v188_v47  ;;  %v187_v54 = vld [vmem:[#allocation10 + $0x100] sm:$0xff]  ;;  %v189_v56 = vld [vmem:[#allocation10 + $0x110] sm:$0xff] }
  0x67   :  { %591 = vmatpush1.bf16.msra.mxu0 %v590_v35  ;;  %v191_v55 = vld [vmem:[#allocation10 + $0x120] sm:$0xff]  ;;  %v628_v57 = vpack.c.bf16 %v194_v50, %v190_v49  ;;  %v193_v58 = vld [vmem:[#allocation10 + $0x130] sm:$0xff]  ;;  %v196_v59 = vld [vmem:[#allocation10 + $0x148] sm:$0xff] }
  0x68   :  { %623 = vmatpush1.bf16.msra.mxu1 %v622_v39  ;;  %593 = vmatprep.subr.bf16.mxu0 %v592_v40  ;;  %v200_v60 = vld [vmem:[#allocation10 + $0x168] sm:$0xff]  ;;  %v198_v61 = vld [vmem:[#allocation10 + $0x158] sm:$0xff]  ;;  %v598_v63 = vpack.c.bf16 %v191_v55, %v187_v54  ;;  %v630_v1 = vpack.c.bf16 %v193_v58, %v189_v56  ;;  %v195_v3 = vld [vmem:[#allocation10 + $0x140] sm:$0xff] }
  0x69   :  { %625 = vmatprep.subr.bf16.mxu1 %v624_v44  ;;  %v202_v62 = vld [vmem:[#allocation10 + $0x178] sm:$0xff]  ;;  %v600_v2 = vpack.c.bf16 %v200_v60, %v196_v59  ;;  %v199_v4 = vld [vmem:[#allocation10 + $0x160] sm:$0xff]  ;;  %v197_v5 = vld [vmem:[#allocation10 + $0x150] sm:$0xff] }
  0x6a   :  { %v632_v6 = vpack.c.bf16 %v202_v62, %v198_v61  ;;  %v201_v7 = vld [vmem:[#allocation10 + $0x170] sm:$0xff]  ;;  %v204_v8 = vld [vmem:[#allocation10 + $0x188] sm:$0xff]  ;;  %v206_v10 = vld [vmem:[#allocation10 + $0x198] sm:$0xff]  ;;  %v602_v12 = vpack.c.bf16 %v199_v4, %v195_v3 }
  0x6b   :  { %595 = vmatpush1.bf16.msra.mxu0 %v594_v51  ;;  %v208_v9 = vld [vmem:[#allocation10 + $0x1a8] sm:$0xff]  ;;  %v210_v11 = vld [vmem:[#allocation10 + $0x1b8] sm:$0xff]  ;;  %v634_v13 = vpack.c.bf16 %v201_v7, %v197_v5  ;;  %v203_v15 = vld [vmem:[#allocation10 + $0x180] sm:$0xff] }
  0x6c   :  { %627 = vmatpush1.bf16.msra.mxu1 %v626_v52  ;;  %597 = vmatprep.subr.bf16.mxu0 %v596_v53  ;;  %v604_v14 = vpack.c.bf16 %v208_v9, %v204_v8  ;;  %v207_v16 = vld [vmem:[#allocation10 + $0x1a0] sm:$0xff]  ;;  %v205_v17 = vld [vmem:[#allocation10 + $0x190] sm:$0xff]  ;;  %v636_v18 = vpack.c.bf16 %v210_v11, %v206_v10  ;;  %v212_v20 = vld [vmem:[#allocation10 + $0x1c8] sm:$0xff] }
  0x6d   :  { %629 = vmatprep.subr.bf16.mxu1 %v628_v57  ;;  %v209_v19 = vld [vmem:[#allocation10 + $0x1b0] sm:$0xff]  ;;  %v216_v21 = vld [vmem:[#allocation10 + $0x1e8] sm:$0xff]  ;;  %v214_v22 = vld [vmem:[#allocation10 + $0x1d8] sm:$0xff]  ;;  %v606_v24 = vpack.c.bf16 %v207_v16, %v203_v15 }
  0x6e   :  { %v218_v23 = vld [vmem:[#allocation10 + $0x1f8] sm:$0xff]  ;;  %v638_v25 = vpack.c.bf16 %v209_v19, %v205_v17  ;;  %v608_v26 = vpack.c.bf16 %v216_v21, %v212_v20  ;;  %v211_v27 = vld [vmem:[#allocation10 + $0x1c0] sm:$0xff]  ;;  %v213_v29 = vld [vmem:[#allocation10 + $0x1d0] sm:$0xff] }
  0x6f   :  { %599 = vmatpush1.bf16.msra.mxu0 %v598_v63  ;;  %v215_v28 = vld [vmem:[#allocation10 + $0x1e0] sm:$0xff]  ;;  %v640_v30 = vpack.c.bf16 %v218_v23, %v214_v22  ;;  %v217_v31 = vld [vmem:[#allocation10 + $0x1f0] sm:$0xff]  ;;  %v91_v32 = vld [vmem:[#allocation8 + $0x8] sm:$0xff] }
  0x70   :  { %631 = vmatpush1.bf16.msra.mxu1 %v630_v1  ;;  %601 = vmatprep.subr.bf16.mxu0 %v600_v2  ;;  %v95_v33 = vld [vmem:[#allocation8 + $0x28] sm:$0xff]  ;;  %v93_v34 = vld [vmem:[#allocation8 + $0x18] sm:$0xff]  ;;  %v610_v36 = vpack.c.bf16 %v215_v28, %v211_v27  ;;  %v642_v37 = vpack.c.bf16 %v217_v31, %v213_v29  ;;  %v90_v39 = vld [vmem:[#allocation8] sm:$0xff] }
  0x71   :  { %633 = vmatprep.subr.bf16.mxu1 %v632_v6  ;;  %v97_v35 = vld [vmem:[#allocation8 + $0x38] sm:$0xff]  ;;  %v644_v38 = vpack.c.bf16 %v95_v33, %v91_v32  ;;  %v94_v40 = vld [vmem:[#allocation8 + $0x20] sm:$0xff]  ;;  %v92_v41 = vld [vmem:[#allocation8 + $0x10] sm:$0xff] }
  0x72   :  { %v676_v42 = vpack.c.bf16 %v97_v35, %v93_v34  ;;  %v96_v43 = vld [vmem:[#allocation8 + $0x30] sm:$0xff]  ;;  %v99_v44 = vld [vmem:[#allocation8 + $0x48] sm:$0xff]  ;;  %v101_v46 = vld [vmem:[#allocation8 + $0x58] sm:$0xff]  ;;  %v646_v49 = vpack.c.bf16 %v94_v40, %v90_v39 }
  0x73   :  { %603 = vmatpush1.bf16.msra.mxu0 %v602_v12  ;;  %v103_v45 = vld [vmem:[#allocation8 + $0x68] sm:$0xff]  ;;  %v105_v47 = vld [vmem:[#allocation8 + $0x78] sm:$0xff]  ;;  %v154_v48 = vld [vmem:[#allocation5] sm:$0xff]  ;;  %v678_v50 = vpack.c.bf16 %v96_v43, %v92_v41 }
  0x74   :  { %635 = vmatpush1.bf16.msra.mxu1 %v634_v13  ;;  %605 = vmatprep.subr.bf16.mxu0 %v604_v14  ;;  %v648_v51 = vpack.c.bf16 %v103_v45, %v99_v44  ;;  %v98_v52 = vld [vmem:[#allocation8 + $0x40] sm:$0xff]  ;;  %v100_v54 = vld [vmem:[#allocation8 + $0x50] sm:$0xff]  ;;  %v680_v55 = vpack.c.bf16 %v105_v47, %v101_v46  ;;  %v107_v57 = vld [vmem:[#allocation8 + $0x88] sm:$0xff] }
  0x75   :  { %637 = vmatprep.subr.bf16.mxu1 %v636_v18  ;;  %v102_v53 = vld [vmem:[#allocation8 + $0x60] sm:$0xff]  ;;  %v104_v56 = vld [vmem:[#allocation8 + $0x70] sm:$0xff]  ;;  %v111_v58 = vld [vmem:[#allocation8 + $0xa8] sm:$0xff] }
  0x76   :  { %v109_v59 = vld [vmem:[#allocation8 + $0x98] sm:$0xff]  ;;  %v650_v61 = vpack.c.bf16 %v102_v53, %v98_v52  ;;  %v682_v62 = vpack.c.bf16 %v104_v56, %v100_v54  ;;  %v652_v63 = vpack.c.bf16 %v111_v58, %v107_v57  ;;  %v106_v1 = vld [vmem:[#allocation8 + $0x80] sm:$0xff]  ;;  %v108_v3 = vld [vmem:[#allocation8 + $0x90] sm:$0xff] }
  0x77   :  { %607 = vmatpush1.bf16.msra.mxu0 %v606_v24  ;;  %v113_v60 = vld [vmem:[#allocation8 + $0xb8] sm:$0xff]  ;;  %v110_v2 = vld [vmem:[#allocation8 + $0xa0] sm:$0xff]  ;;  %v112_v5 = vld [vmem:[#allocation8 + $0xb0] sm:$0xff] }
  0x78   :  { %639 = vmatpush1.bf16.msra.mxu1 %v638_v25  ;;  %609 = vmatprep.subr.bf16.mxu0 %v608_v26  ;;  %v684_v4 = vpack.c.bf16 %v113_v60, %v109_v59  ;;  %v115_v6 = vld [vmem:[#allocation8 + $0xc8] sm:$0xff]  ;;  %v117_v8 = vld [vmem:[#allocation8 + $0xd8] sm:$0xff]  ;;  %v654_v10 = vpack.c.bf16 %v110_v2, %v106_v1  ;;  %v686_v11 = vpack.c.bf16 %v112_v5, %v108_v3  ;;  %v114_v13 = vld [vmem:[#allocation8 + $0xc0] sm:$0xff]  ;;  %v505_v5 = vlaneseq }
  0x79   :  { %641 = vmatprep.subr.bf16.mxu1 %v640_v30  ;;  %v119_v7 = vld [vmem:[#allocation8 + $0xe8] sm:$0xff]  ;;  %v121_v9 = vld [vmem:[#allocation8 + $0xf8] sm:$0xff]  ;;  %v118_v14 = vld [vmem:[#allocation8 + $0xe0] sm:$0xff] }
  0x7a   :  { %v656_v12 = vpack.c.bf16 %v119_v7, %v115_v6  ;;  %v116_v15 = vld [vmem:[#allocation8 + $0xd0] sm:$0xff]  ;;  %v688_v16 = vpack.c.bf16 %v121_v9, %v117_v8  ;;  %v123_v18 = vld [vmem:[#allocation8 + $0x108] sm:$0xff]  ;;  %v125_v20 = vld [vmem:[#allocation8 + $0x118] sm:$0xff]  ;;  %v658_v22 = vpack.c.bf16 %v118_v14, %v114_v13  ;;  %v506_v6 = vshrl.u32 %v505_v5, 7 }
  0x7b   :  { %611 = vmatpush1.bf16.msra.mxu0 %v610_v36  ;;  %v120_v17 = vld [vmem:[#allocation8 + $0xf0] sm:$0xff]  ;;  %v127_v19 = vld [vmem:[#allocation8 + $0x128] sm:$0xff]  ;;  %v129_v21 = vld [vmem:[#allocation8 + $0x138] sm:$0xff] }
  0x7c   :  { %643 = vmatpush1.bf16.msra.mxu1 %v642_v37  ;;  %645 = vmatprep.subr.bf16.mxu0 %v644_v38  ;;  %v660_v23 = vpack.c.bf16 %v127_v19, %v123_v18  ;;  %v122_v24 = vld [vmem:[#allocation8 + $0x100] sm:$0xff]  ;;  %v124_v26 = vld [vmem:[#allocation8 + $0x110] sm:$0xff]  ;;  %v692_v27 = vpack.c.bf16 %v129_v21, %v125_v20  ;;  %v131_v29 = vld [vmem:[#allocation8 + $0x148] sm:$0xff]  ;;  %v507_v7 = vsub.s32 0, %v506_v6  ;;  %v515_v9 = vsub.s32 2, %v506_v6 }
  0x7d   :  { %677 = vmatprep.subr.bf16.mxu1 %v676_v42  ;;  %v126_v25 = vld [vmem:[#allocation8 + $0x120] sm:$0xff]  ;;  %v128_v28 = vld [vmem:[#allocation8 + $0x130] sm:$0xff]  ;;  %v135_v30 = vld [vmem:[#allocation8 + $0x168] sm:$0xff] }
  0x7e   :  { %284 = vmatmul.mubr.f32.vlgmr.msra.gmra.mrb[0].mxu0 %v154_v48  ;;  %v133_v31 = vld [vmem:[#allocation8 + $0x158] sm:$0xff]  ;;  %v662_v33 = vpack.c.bf16 %v126_v25, %v122_v24  ;;  %v694_v34 = vpack.c.bf16 %v128_v28, %v124_v26  ;;  %v664_v35 = vpack.c.bf16 %v135_v30, %v131_v29  ;;  %v130_v36 = vld [vmem:[#allocation8 + $0x140] sm:$0xff]  ;;  %v132_v38 = vld [vmem:[#allocation8 + $0x150] sm:$0xff] }
  0x7f   :  { %355 = vmatmul.mubr.f32.vlgmr.msra.gmra.mrb[0].mxu1 %v154_v48  ;;  %647 = vmatpush1.bf16.msra.mxu0 %v646_v49  ;;  %v137_v32 = vld [vmem:[#allocation8 + $0x178] sm:$0xff]  ;;  %v134_v37 = vld [vmem:[#allocation8 + $0x160] sm:$0xff]  ;;  %v136_v40 = vld [vmem:[#allocation8 + $0x170] sm:$0xff] }
  0x80   :  { %679 = vmatpush1.bf16.msra.mxu1 %v678_v50  ;;  %649 = vmatprep.subr.bf16.mxu0 %v648_v51  ;;  %v696_v39 = vpack.c.bf16 %v137_v32, %v133_v31  ;;  %v139_v41 = vld [vmem:[#allocation8 + $0x188] sm:$0xff]  ;;  %v141_v43 = vld [vmem:[#allocation8 + $0x198] sm:$0xff]  ;;  %v666_v45 = vpack.c.bf16 %v134_v37, %v130_v36  ;;  %v698_v46 = vpack.c.bf16 %v136_v40, %v132_v38  ;;  %v138_v48 = vld [vmem:[#allocation8 + $0x180] sm:$0xff] }
  0x81   :  { %681 = vmatprep.subr.bf16.mxu1 %v680_v55  ;;  %425 = vmatprep.mubr.f32.mxu0 %v905_v0  ;;  %v143_v42 = vld [vmem:[#allocation8 + $0x1a8] sm:$0xff]  ;;  %v145_v44 = vld [vmem:[#allocation8 + $0x1b8] sm:$0xff]  ;;  %v142_v49 = vld [vmem:[#allocation8 + $0x1a0] sm:$0xff] }
  0x82   :  { %496 = vmatprep.mubr.f32.mxu1 %v905_v0  ;;  %v690_v0 = vpack.c.bf16 %v120_v17, %v116_v15  ;;  %v668_v47 = vpack.c.bf16 %v143_v42, %v139_v41  ;;  %v140_v50 = vld [vmem:[#allocation8 + $0x190] sm:$0xff]  ;;  %v700_v51 = vpack.c.bf16 %v145_v44, %v141_v43  ;;  %v147_v53 = vld [vmem:[#allocation8 + $0x1c8] sm:$0xff]  ;;  %v149_v55 = vld [vmem:[#allocation8 + $0x1d8] sm:$0xff]  ;;  %v670_v57 = vpack.c.bf16 %v142_v49, %v138_v48 }
  0x83   :  { %651 = vmatpush1.bf16.msra.mxu0 %v650_v61  ;;  %v144_v52 = vld [vmem:[#allocation8 + $0x1b0] sm:$0xff]  ;;  %v151_v54 = vld [vmem:[#allocation8 + $0x1e8] sm:$0xff]  ;;  %v153_v56 = vld [vmem:[#allocation8 + $0x1f8] sm:$0xff] }
  0x84   :  { %683 = vmatpush1.bf16.msra.mxu1 %v682_v62  ;;  %653 = vmatprep.subr.bf16.mxu0 %v652_v63  ;;  %v702_v58 = vpack.c.bf16 %v144_v52, %v140_v50  ;;  %v672_v59 = vpack.c.bf16 %v151_v54, %v147_v53  ;;  %v146_v60 = vld [vmem:[#allocation8 + $0x1c0] sm:$0xff]  ;;  %v704_v62 = vpack.c.bf16 %v153_v56, %v149_v55  ;;  %v148_v63 = vld [vmem:[#allocation8 + $0x1d0] sm:$0xff]  ;;  %v503_v8 = vld [vmem:[%s1057_s5] sm:$0xf]  ;;  %s906_s5 = smov [#allocation12]  }
  0x85   :  { %685 = vmatprep.subr.bf16.mxu1 %v684_v4  ;;  %v150_v61 = vld [vmem:[#allocation8 + $0x1e0] sm:$0xff]  ;;  %v152_v1 = vld [vmem:[#allocation8 + $0x1f0] sm:$0xff]  ;;  %v89_v4 = vld [vmem:[#allocation2] sm:$0xff]  ;;  %v516_v13 = vrot.slane %v503_v8, %v515_v9  ;;  %s564_s23 = sshll.u32 %s906_s5, 4  ;;  %s565_s23 = int_to_ptr.vmem [resolvable:$true] %s564_s23 }
  0x86   :  { %v674_v2 = vpack.c.bf16 %v150_v61, %v146_v60  ;;  %v706_v3 = vpack.c.bf16 %v152_v1, %v148_v63  ;;  %s844_s3 = scalar_lea.vmem %s565_s23, 128  ;;  %p849_p13 = scmp.lt.s32.totalorder %s565_s23, %s565_s23 }
  0x87   :  { %655 = vmatpush1.bf16.msra.mxu0 %v654_v10  ;;  %v511_v10 = vsub.s32 1, %v506_v6  ;;  %p845_p12 = scmp.ne.s32.totalorder %s565_s23, %s844_s3  ;;  %p850_p0 = scmp.lt.s32.totalorder %s844_s3, %s844_s3 }
  0x88   :  { %687 = vmatpush1.bf16.msra.mxu1 %v686_v11  ;;  %657 = vmatprep.subr.bf16.mxu0 %v656_v12  ;;  %v519_v11 = vsub.s32 3, %v506_v6  ;;  %v508_v12 = vrot.slane %v503_v8, %v507_v7 }
  0x89   :  { %689 = vmatprep.subr.bf16.mxu1 %v688_v16  ;;  %v512_v14 = vrot.slane %v503_v8, %v511_v10  ;;  %p851_p1 = por %p850_p0, %p849_p13 }
  0x8a   :  { %v520_v15 = vrot.slane %v503_v8, %v519_v11 }
  0x8b   :  { %659 = vmatpush1.bf16.msra.mxu0 %v658_v22  ;;  %p852_p2 = pnand %p851_p1, %p845_p12 }
  0x8c   :  { %691 = vmatpush1.bf16.msra.mxu1 %v690_v0  ;;  %661 = vmatprep.subr.bf16.mxu0 %v660_v23 }
  0x8d   :  { %693 = vmatprep.subr.bf16.mxu1 %v692_v27  ;;  %v540_v27 = vld [vmem:[#allocation7] sm:$0xff] }
  0x8f   :  { %663 = vmatpush1.bf16.msra.mxu0 %v662_v33 }
  0x90   :  { %695 = vmatpush1.bf16.msra.mxu1 %v694_v34  ;;  %665 = vmatprep.subr.bf16.mxu0 %v664_v35 }
  0x91   :  { %697 = vmatprep.subr.bf16.mxu1 %v696_v39 }
  0x93   :  { %667 = vmatpush1.bf16.msra.mxu0 %v666_v45 }
  0x94   :  { %699 = vmatpush1.bf16.msra.mxu1 %v698_v46  ;;  %669 = vmatprep.subr.bf16.mxu0 %v668_v47 }
  0x95   :  { %701 = vmatprep.subr.bf16.mxu1 %v700_v51 }
  0x97   :  { %671 = vmatpush1.bf16.msra.mxu0 %v670_v57 }
  0x98   :  { %703 = vmatpush1.bf16.msra.mxu1 %v702_v58  ;;  %673 = vmatprep.subr.bf16.mxu0 %v672_v59 }
  0x99   :  { %705 = vmatprep.subr.bf16.mxu1 %v704_v62 }
  0x9b   :  { %675 = vmatpush1.bf16.msra.mxu0 %v674_v2 }
  0x9c   :  { %707 = vmatpush1.bf16.msra.mxu1 %v706_v3 }
  0x9e   :  { %426 = vmatmul.mubr.f32.vlgmr.msra.gmra.mrb[0].mxu0 %v89_v4 }
  0x9f   :  { %497 = vmatmul.mubr.f32.vlgmr.msra.gmra.mrb[0].mxu1 %v89_v4 }
 0x171   :  { %v427_v16 = vpop.f32.mrb[0].mxu0 }
 0x172   :  { %v525_v17 = vadd.f32 %v508_v12, %v427_v16  ;;  %v498_v18 = vpop.f32.mrb[0].mxu1  ;;  %v429_v19 = vpop.f32.mrb[1].mxu0 }
 0x173   :  { %v527_v20 = vadd.f32 %v516_v13, %v498_v18  ;;  %v526_v21 = vadd.f32 %v512_v14, %v429_v19  ;;  %v500_v22 = vpop.f32.mrb[1].mxu1 }
 0x174   :  { %v529_v0 = vmul.f32 1.442695, %v525_v17  ;;  %v528_v23 = vadd.f32 %v520_v15, %v500_v22 }
 0x175   :  { %722 = vtanh.f32 %v527_v20  ;;  %v531_v24 = vmul.f32 1.442695, %v526_v21 }
 0x176   :  { %724 = vpow2.f32 %v529_v0  ;;  %v579_v25 = vmul.f32 -1.442695, %v528_v23 }
 0x177   :  { %726 = vpow2.f32 %v531_v24 }
 0x178   :  { %728 = vpow2.f32 %v579_v25 }
 0x17f   :  { %v723_v26 = vpop.eup %722 }
 0x180   :  { %v725_v28 = vpop.eup %724 }
 0x181   :  { %v727_v29 = vpop.eup %726  ;;  %v542_v30 = vmul.f32 %v725_v28, %v723_v26 }
 0x182   :  { %v729_v31 = vpop.eup %728  ;;  %v541_v32 = vmul.f32 %v727_v29, %v540_v27 }
 0x183   :  { %v537_v33 = vadd.f32 1.0, %v729_v31 }
 0x184   :  { %v543_v34 = vadd.f32 %v542_v30, %v541_v32 }
 0x185   :  { %730 = vrcp.f32 %v537_v33 }
 0x186   :  { %547 = vst [vmem:[#allocation12] sm:$0xff] %v543_v34  ;;  %732 = vtanh.f32 %v543_v34 }
 0x187   :  { %855 = shalt.err (!%p852_p2)
}
 0x188   :  { %s856_s16 = scalar_lea.hbm %s1059_s7, 128 }
 0x189   :  { %p857_p3 = scmp.ne.s32.totalorder %s1059_s7, %s856_s16  ;;  %p860_p4 = scmp.lt.u32.totalorder %s856_s16, %s1059_s7 }
 0x18b   :  { %p862_p5 = pnand %p860_p4, %p857_p3 }
 0x18d   :  { %865 = shalt.err (!%p862_p5)
}
 0x18e   :  { %567 = dma.vmem_to_hbm [thread:$0]  %s565_s23, 128, %s1059_s7, [#allocation13]  }
 0x18f   :  { %s907_s24 = smov [#allocation11]   ;;  %v731_v35 = vpop.eup %730 }
 0x190   :  { %s554_s0 = sshll.u32 %s907_s24, 4  ;;  %v733_v36 = vpop.eup %732  ;;  %s555_s0 = int_to_ptr.vmem [resolvable:$true] %s554_s0 }
 0x191   :  { %v545_v37 = vmul.f32 %v733_v36, %v731_v35  ;;  %s866_s25 = scalar_lea.vmem %s555_s0, 128  ;;  %p871_p7 = scmp.lt.s32.totalorder %s555_s0, %s555_s0 }
 0x192   :  { %p867_p6 = scmp.ne.s32.totalorder %s555_s0, %s866_s25  ;;  %p872_p8 = scmp.lt.s32.totalorder %s866_s25, %s866_s25 }
 0x193   :  { %546 = vst [vmem:[#allocation11] sm:$0xff] %v545_v37 }
 0x194   :  { %p873_p9 = por %p872_p8, %p871_p7 }
 0x196   :  { %p874_p10 = pnand %p873_p9, %p867_p6 }
 0x198   :  { %877 = shalt.err (!%p874_p10)
}
 0x199   :  { %s878_s29 = scalar_lea.hbm %s1058_s6, 128 }
 0x19a   :  { %p879_p11 = scmp.ne.s32.totalorder %s1058_s6, %s878_s29  ;;  %p882_p12 = scmp.lt.u32.totalorder %s878_s29, %s1058_s6 }
 0x19c   :  { %p884_p13 = pnand %p882_p12, %p879_p11 }
 0x19e   :  { %887 = shalt.err (!%p884_p13)
}
 0x19f   :  { %557 = dma.vmem_to_hbm [thread:$0]  %s555_s0, 128, %s1058_s6, [#allocation4]  }
 0x1a0   :  { %894 = dma.done.wait [#allocation4], 128  }
 0x1a1   :  { %895 = vsyncadd [#allocation4], 4294967168 }
 0x1a2   :  { %896 = dma.done.wait [#allocation13], 128  }
 0x1a3   :  { %897 = vsyncadd [#allocation13], 4294967168 }
 0x1a4   :  { %574 = vsyncpa [#allocation3], 1 }
 0x1a5   :  { %575 = vsyncpa [#allocation6], 1 }
 0x1a6   :  { %576 = vsyncpa [#allocation9], 1 }
 0x1a7   :  { %577 = vsyncpa [#allocation4], 1 }
 0x1a8   :  { %578 = vsyncpa [#allocation13], 1 }

</bundles_post_ra>
